<compile_context>
chip_gen: v6e
topology: v6e:2x2x1
jax: 0.10.0
libtpu: 0.0.40
codegen_flags: <defaults>
</compile_context>

<pallas_src>
import functools

import jax
import jax.numpy as jnp
from jax import lax
from jax.experimental import pallas as pl
from jax.experimental.pallas import tpu as pltpu

LANE = 128
EPS = 1e-5


def _round_up(x, m):
    return ((x + m - 1) // m) * m


def _node_tiling(n):
    """(n_pad, row_tile, k_tile) for the node axis."""
    if n <= 256:
        n_pad = _round_up(n, 8)
        return n_pad, n_pad, n_pad
    n_pad = _round_up(n, 512)
    return n_pad, 256, 512


# ----------------------------------------------------------------------------
# Kernels
# ----------------------------------------------------------------------------
def linear_kernel(x_ref, w_ref, o_ref):
    # XW[row_tile] = X[row_tile] @ W  (bf16 operands, f32 accumulation).
    o_ref[...] = jnp.dot(
        x_ref[...].astype(jnp.bfloat16), w_ref[...],
        preferred_element_type=jnp.float32).astype(o_ref.dtype)


def aggregate_kernel(a_ref, xw_ref, b_ref, o_ref, acc_ref, *, out_dim,
                     log_softmax):
    # Y[row_tile] = sum_k A[row_tile, k_tile] @ XW[k_tile] + b
    k = pl.program_id(1)

    @pl.when(k == 0)
    def _():
        acc_ref[...] = jnp.zeros_like(acc_ref)

    acc_ref[...] += jnp.dot(a_ref[...], xw_ref[...],
                            preferred_element_type=jnp.float32)

    @pl.when(k == pl.num_programs(1) - 1)
    def _():
        y = acc_ref[...] + b_ref[...]
        if log_softmax:
            # LogSoftmax over the true feature columns only (padded lanes
            # are masked to -inf so exp() contributes 0, then zeroed).
            col = lax.broadcasted_iota(jnp.int32, y.shape, 1)
            valid = col < out_dim
            y = jnp.where(valid, y, -jnp.inf)
            m = jnp.max(y, axis=1, keepdims=True)
            z = y - m
            lse = jnp.log(jnp.sum(jnp.exp(z), axis=1, keepdims=True))
            y = jnp.where(valid, z - lse, 0.0)
        o_ref[...] = y


def bn_stats_kernel(y_ref, sum_ref, sumsq_ref, *, n_true, tile_m):
    # Accumulate per-column sum / sum-of-squares across row tiles (padded
    # rows masked out).
    i = pl.program_id(0)

    @pl.when(i == 0)
    def _():
        sum_ref[...] = jnp.zeros_like(sum_ref)
        sumsq_ref[...] = jnp.zeros_like(sumsq_ref)

    y = y_ref[...]
    row = lax.broadcasted_iota(jnp.int32, y.shape, 0) + i * tile_m
    y = jnp.where(row < n_true, y, 0.0)
    sum_ref[...] += jnp.sum(y, axis=0, keepdims=True)
    sumsq_ref[...] += jnp.sum(y * y, axis=0, keepdims=True)


def bn_relu_dropout_kernel(y_ref, sum_ref, sumsq_ref, gamma_ref, beta_ref,
                           drop_ref, o_ref, *, n_true):
    # BatchNorm1d (training mode, biased variance, eps=1e-5) -> ReLU ->
    # inverted dropout (precomputed keep/scale mask).
    inv_n = 1.0 / float(n_true)
    mean = sum_ref[...] * inv_n
    var = jnp.maximum(sumsq_ref[...] * inv_n - mean * mean, 0.0)
    y = (y_ref[...] - mean) * lax.rsqrt(var + EPS) * gamma_ref[...] \
        + beta_ref[...]
    y = jnp.maximum(y, 0.0)
    o_ref[...] = y * drop_ref[...]


# ----------------------------------------------------------------------------
# pallas_call wrappers
# ----------------------------------------------------------------------------
def linear(x_pad, w_pad, *, tile_m):
    n_pad, f_in = x_pad.shape
    f_out = w_pad.shape[1]
    return pl.pallas_call(
        linear_kernel,
        out_shape=jax.ShapeDtypeStruct((n_pad, f_out), jnp.bfloat16),
        grid=(n_pad // tile_m,),
        in_specs=[
            pl.BlockSpec((tile_m, f_in), lambda i: (i, 0)),
            pl.BlockSpec((f_in, f_out), lambda i: (0, 0)),
        ],
        out_specs=pl.BlockSpec((tile_m, f_out), lambda i: (i, 0)),
        compiler_params=pltpu.CompilerParams(
            dimension_semantics=("parallel",)),
    )(x_pad, w_pad)


def aggregate(a_bf16, xw_bf16, b_pad, *, tile_m, tile_k, out_dim,
              log_softmax):
    n_pad = a_bf16.shape[0]
    f_out = xw_bf16.shape[1]
    kernel = functools.partial(aggregate_kernel, out_dim=out_dim,
                               log_softmax=log_softmax)
    flops = 2 * n_pad * n_pad * f_out
    bytes_accessed = n_pad * n_pad * 2 + n_pad * f_out * 2 + n_pad * f_out * 4
    return pl.pallas_call(
        kernel,
        out_shape=jax.ShapeDtypeStruct((n_pad, f_out), jnp.float32),
        grid=(n_pad // tile_m, n_pad // tile_k),
        in_specs=[
            pl.BlockSpec((tile_m, tile_k), lambda i, k: (i, k)),   # A tile
            pl.BlockSpec((tile_k, f_out), lambda i, k: (k, 0)),    # XW tile
            pl.BlockSpec((1, f_out), lambda i, k: (0, 0)),         # bias
        ],
        out_specs=pl.BlockSpec((tile_m, f_out), lambda i, k: (i, 0)),
        scratch_shapes=[pltpu.VMEM((tile_m, f_out), jnp.float32)],
        compiler_params=pltpu.CompilerParams(
            dimension_semantics=("parallel", "arbitrary"),
            vmem_limit_bytes=64 * 1024 * 1024),
        cost_estimate=pl.CostEstimate(
            flops=flops,
            transcendentals=(n_pad * f_out if log_softmax else 0),
            bytes_accessed=bytes_accessed),
    )(a_bf16, xw_bf16, b_pad)


def bn_stats(y_pad, *, tile_m, n_true):
    n_pad, f = y_pad.shape
    kernel = functools.partial(bn_stats_kernel, n_true=n_true, tile_m=tile_m)
    return pl.pallas_call(
        kernel,
        out_shape=(jax.ShapeDtypeStruct((1, f), jnp.float32),
                   jax.ShapeDtypeStruct((1, f), jnp.float32)),
        grid=(n_pad // tile_m,),
        in_specs=[pl.BlockSpec((tile_m, f), lambda i: (i, 0))],
        out_specs=(pl.BlockSpec((1, f), lambda i: (0, 0)),
                   pl.BlockSpec((1, f), lambda i: (0, 0))),
        compiler_params=pltpu.CompilerParams(
            dimension_semantics=("arbitrary",)),
    )(y_pad)


def bn_relu_dropout(y_pad, col_sum, col_sumsq, gamma_pad, beta_pad,
                    drop_scale, *, tile_m, n_true):
    n_pad, f = y_pad.shape
    kernel = functools.partial(bn_relu_dropout_kernel, n_true=n_true)
    return pl.pallas_call(
        kernel,
        out_shape=jax.ShapeDtypeStruct((n_pad, f), jnp.float32),
        grid=(n_pad // tile_m,),
        in_specs=[
            pl.BlockSpec((tile_m, f), lambda i: (i, 0)),   # Y tile
            pl.BlockSpec((1, f), lambda i: (0, 0)),        # col sum
            pl.BlockSpec((1, f), lambda i: (0, 0)),        # col sumsq
            pl.BlockSpec((1, f), lambda i: (0, 0)),        # gamma
            pl.BlockSpec((1, f), lambda i: (0, 0)),        # beta
            pl.BlockSpec((tile_m, f), lambda i: (i, 0)),   # dropout scale
        ],
        out_specs=pl.BlockSpec((tile_m, f), lambda i: (i, 0)),
        compiler_params=pltpu.CompilerParams(
            dimension_semantics=("parallel",)),
    )(y_pad, col_sum, col_sumsq, gamma_pad, beta_pad, drop_scale)


# ----------------------------------------------------------------------------
# Plain-JAX glue
# ----------------------------------------------------------------------------
def build_norm_adj(edge_index, num_nodes):
    """Dense D^-1/2 (A + I) D^-1/2 from edge_index [2, E] (src, dst)."""
    src, dst = edge_index[0], edge_index[1]
    a = jnp.zeros((num_nodes, num_nodes), jnp.float32)
    a = a.at[dst, src].set(1.0)            # message j -> i lands in row i
    a_hat = a + jnp.eye(num_nodes, dtype=jnp.float32)   # self loops
    deg = jnp.sum(a_hat, axis=1)
    d_inv_sqrt = jnp.where(deg > 0, 1.0 / jnp.sqrt(deg), 0.0)
    return a_hat * d_inv_sqrt[:, None] * d_inv_sqrt[None, :]


def _pad2(x, rows, cols):
    return jnp.pad(x, ((0, rows - x.shape[0]), (0, cols - x.shape[1])))


def gcn_forward(x, edge_index, params, drop_scales=None, return_embeds=False):
    n, in_dim = x.shape
    out_dim = params["weights"][-1].shape[1]
    n_pad, tile_m, tile_k = _node_tiling(n)
    num_layers = len(params["weights"])

    # Pad + cast A_norm to bf16 ONCE; all layers reuse it.
    a_norm = build_norm_adj(edge_index, n)
    a_bf16 = _pad2(a_norm, n_pad, n_pad).astype(jnp.bfloat16)

    h = _pad2(x, n_pad, _round_up(in_dim, LANE)).astype(jnp.float32)

    for layer in range(num_layers - 1):
        w = params["weights"][layer]
        f_out = _round_up(w.shape[1], LANE)
        w_pad = _pad2(w, _round_up(w.shape[0], LANE), f_out).astype(
            jnp.bfloat16)
        b_pad = _pad2(params["biases"][layer].reshape(1, -1), 1, f_out)
        gamma_pad = _pad2(params["bn_gamma"][layer].reshape(1, -1), 1, f_out)
        beta_pad = _pad2(params["bn_beta"][layer].reshape(1, -1), 1, f_out)

        xw = linear(h, w_pad, tile_m=tile_m)
        y = aggregate(a_bf16, xw, b_pad, tile_m=tile_m, tile_k=tile_k,
                      out_dim=w.shape[1], log_softmax=False)
        col_sum, col_sumsq = bn_stats(y, tile_m=tile_m, n_true=n)

        # Inverted-dropout keep/scale mask (F.dropout training=True default).
        # TODO(synk): on pure-TPU runs this could be drawn in-kernel with
        # pltpu.prng_seed/prng_random_bits (seed folded with program_id); a
        # host-side mask is used so the kernel also runs in interpret mode.
        if drop_scales is not None:
            drop = drop_scales[layer]
        else:
            drop = jnp.ones((n_pad, f_out), jnp.float32)

        h = bn_relu_dropout(y, col_sum, col_sumsq, gamma_pad, beta_pad,
                            drop, tile_m=tile_m, n_true=n)

    w = params["weights"][-1]
    f_out = _round_up(w.shape[1], LANE)
    w_pad = _pad2(w, _round_up(w.shape[0], LANE), f_out).astype(jnp.bfloat16)
    b_pad = _pad2(params["biases"][-1].reshape(1, -1), 1, f_out)
    xw = linear(h, w_pad, tile_m=tile_m)
    out = aggregate(a_bf16, xw, b_pad, tile_m=tile_m, tile_k=tile_k,
                    out_dim=w.shape[1],
                    log_softmax=not return_embeds)   # return_embeds skips it
    return out[:n, :out_dim]


def gcn_reference(x, a_norm, params, drop_scales, n, return_embeds=False):
    """Pure-JAX reference mirroring the kernel's bf16 matmul casts."""
    h = x
    num_layers = len(params["weights"])
    a16 = a_norm.astype(jnp.bfloat16)
    for layer in range(num_layers - 1):
        w = params["weights"][layer].astype(jnp.bfloat16)
        xw = jnp.dot(h.astype(jnp.bfloat16), w,
                     preferred_element_type=jnp.float32).astype(jnp.bfloat16)
        y = jnp.dot(a16, xw, preferred_element_type=jnp.float32) \
            + params["biases"][layer]
        mean = jnp.mean(y, axis=0, keepdims=True)
        var = jnp.mean((y - mean) ** 2, axis=0, keepdims=True)
        y = (y - mean) * lax.rsqrt(var + EPS) * params["bn_gamma"][layer] \
            + params["bn_beta"][layer]
        y = jnp.maximum(y, 0.0)
        h = y * drop_scales[layer][:n, :w.shape[1]]
    w = params["weights"][-1].astype(jnp.bfloat16)
    xw = jnp.dot(h.astype(jnp.bfloat16), w,
                 preferred_element_type=jnp.float32).astype(jnp.bfloat16)
    y = jnp.dot(a16, xw, preferred_element_type=jnp.float32) \
        + params["biases"][-1]
    if return_embeds:
        return y
    return jax.nn.log_softmax(y, axis=1)


def glorot(key, fan_in, fan_out):
    bound = (6.0 / (fan_in + fan_out)) ** 0.5
    return jax.random.uniform(key, (fan_in, fan_out), jnp.float32,
                              -bound, bound)


# ----------------------------------------------------------------------------
# Main
# ----------------------------------------------------------------------------
if __name__ == "__main__":
    num_nodes = 16
    input_dim = 8
    hidden_dim = 32
    output_dim = 4
    num_layers = 3
    dropout_p = 0.5

    key = jax.random.PRNGKey(0)
    k_x, k_w0, k_w1, k_w2, k_drop = jax.random.split(key, 5)

    # Node features and a symmetric ring graph (both directions per edge).
    x = jax.random.normal(k_x, (num_nodes, input_dim), jnp.float32)
    src = jnp.arange(num_nodes, dtype=jnp.int32)
    dst = (src + 1) % num_nodes
    edge_index = jnp.stack([jnp.concatenate([src, dst]),
                            jnp.concatenate([dst, src])], axis=0)  # [2, 32]

    layer_dims = ([(input_dim, hidden_dim)]
                  + [(hidden_dim, hidden_dim)] * (num_layers - 2)
                  + [(hidden_dim, output_dim)])
    w_keys = [k_w0, k_w1, k_w2]
    params = {
        "weights": [glorot(w_keys[i], d_in, d_out)
                    for i, (d_in, d_out) in enumerate(layer_dims)],
        "biases": [jnp.zeros((d_out,), jnp.float32)
                   for (_, d_out) in layer_dims],
        "bn_gamma": [jnp.ones((hidden_dim,), jnp.float32)
                     for _ in range(num_layers - 1)],
        "bn_beta": [jnp.zeros((hidden_dim,), jnp.float32)
                    for _ in range(num_layers - 1)],
    }

    # Precompute inverted-dropout keep/scale masks (padded shapes).
    n_pad, _, _ = _node_tiling(num_nodes)
    drop_keys = jax.random.split(k_drop, num_layers - 1)
    drop_scales = []
    for layer in range(num_layers - 1):
        f_out = _round_up(layer_dims[layer][1], LANE)
        keep = jax.random.bernoulli(drop_keys[layer], 1.0 - dropout_p,
                                    (n_pad, f_out))
        drop_scales.append(keep.astype(jnp.float32) / (1.0 - dropout_p))

    out = gcn_forward(x, edge_index, params, drop_scales)
    out = jax.block_until_ready(out)

    assert out.shape == (num_nodes, output_dim)
    assert bool(jnp.all(jnp.isfinite(out)))

    ref = gcn_reference(x, build_norm_adj(edge_index, num_nodes), params,
                        drop_scales, num_nodes)
    max_diff = float(jnp.max(jnp.abs(out - ref)))
    assert max_diff < 1e-2, f"mismatch vs reference: max abs diff {max_diff}"

    print("KERNEL_OK")
</pallas_src>

<mosaic_0001>
module attributes {stable_mosaic.version = 11 : i64} {
  func.func @linear_kernel(%arg0: i32, %arg1: memref<16x128xf32, #tpu.memory_space<vmem>>, %arg2: memref<128x128xbf16, #tpu.memory_space<vmem>>, %arg3: memref<16x128xbf16, #tpu.memory_space<vmem>>) attributes {dimension_semantics = [#tpu.dimension_semantics<parallel>], iteration_bounds = array<i64: 1>, scalar_prefetch = 0 : i64, scratch_operands = 0 : i64, tpu.core_type = #tpu.core_type<tc>, window_params = [{transform_indices = @transform_0, window_bounds = array<i64: 16, 128>}, {pipeline_mode = #tpu.pipeline_mode<synchronous>, transform_indices = @transform_1, window_bounds = array<i64: 128, 128>}, {transform_indices = @transform_2, window_bounds = array<i64: 16, 128>}]} {
    %c0 = arith.constant 0 : index
    %c0_0 = arith.constant 0 : index
    %0 = vector.load %arg1[%c0, %c0_0] : memref<16x128xf32, #tpu.memory_space<vmem>>, vector<16x128xf32>
    %1 = arith.truncf %0 : vector<16x128xf32> to vector<16x128xbf16>
    %c0_1 = arith.constant 0 : index
    %c0_2 = arith.constant 0 : index
    %2 = vector.load %arg2[%c0_1, %c0_2] : memref<128x128xbf16, #tpu.memory_space<vmem>>, vector<128x128xbf16>
    %cst = arith.constant dense<0.000000e+00> : vector<16x128xf32>
    %3 = tpu.matmul %1, %2, %cst {dimension_numbers = #tpu.dot_dimension_numbers<[1], [0], [0], [1], [0, 0, 1, 1], [], []>} : vector<16x128xbf16>, vector<128x128xbf16>, vector<16x128xf32> -> vector<16x128xf32>
    %4 = arith.truncf %3 : vector<16x128xf32> to vector<16x128xbf16>
    %c0_3 = arith.constant 0 : index
    %c0_4 = arith.constant 0 : index
    %5 = vector.load %arg3[%c0_3, %c0_4] : memref<16x128xbf16, #tpu.memory_space<vmem>>, vector<16x128xbf16>
    tpu.vector_store %arg3[%c0_3, %c0_4], %4 {strides = array<i32>} : memref<16x128xbf16, #tpu.memory_space<vmem>>, vector<16x128xbf16>,
    return
  }
  func.func @transform_0(%arg0: i32) -> (i32, i32) {
    %c0_i32 = arith.constant 0 : i32
    %c0_i32_0 = arith.constant 0 : i32
    return %arg0, %c0_i32 : i32, i32
  }
  func.func @transform_1(%arg0: i32) -> (i32, i32) {
    %c0_i32 = arith.constant 0 : i32
    %c0_i32_0 = arith.constant 0 : i32
    %c0_i32_1 = arith.constant 0 : i32
    return %c0_i32, %c0_i32_0 : i32, i32
  }
  func.func @transform_2(%arg0: i32) -> (i32, i32) {
    %c0_i32 = arith.constant 0 : i32
    %c0_i32_0 = arith.constant 0 : i32
    return %arg0, %c0_i32 : i32, i32
  }
}

</mosaic_0001>

<bundles_post_ra>
// kernel: tpu_custom_call.1
= control target key start
LH: loop header
LB: loop body
LE: loop exit
PB: predicated region body
PF: predicated region fallthrough
CT: control target
= control target key end

     0   :  { %7 = vsyncpa [#allocation3], 0  ;;  %s345_s0 = inlined_call_operand.hbm [shape: f32[16,128], index: 0, kind: input, shape index: {}]   ;;  %s346_s1 = inlined_call_operand.hbm [shape: bf16[128,128], index: 1, kind: input, shape index: {}]   ;;  %s347_s2 = inlined_call_operand.hbm [shape: bf16[16,128], index: 2, kind: output, shape index: {}]  }
   0x1   :  { %8 = vsyncpa [#allocation6], 0 }
   0x2   :  { %9 = vsyncpa [#allocation4], 0  ;;  %s306_s9 = smov [#allocation2]  }
   0x3   :  { %s15_s10 = sshll.u32 %s306_s9, 4  ;;  %s16_s10 = int_to_ptr.vmem [resolvable:$true] %s15_s10 }
   0x4   :  { %s248_s11 = scalar_lea.vmem %s16_s10, 256  ;;  %p253_p1 = scmp.lt.s32.totalorder %s16_s10, %s16_s10 }
   0x5   :  { %p249_p0 = scmp.ne.s32.totalorder %s16_s10, %s248_s11  ;;  %p254_p2 = scmp.lt.s32.totalorder %s248_s11, %s248_s11 }
   0x7   :  { %p255_p3 = por %p254_p2, %p253_p1 }
   0x9   :  { %p256_p4 = pnand %p255_p3, %p249_p0 }
   0xb   :  { %259 = shalt.err (!%p256_p4)
}
   0xc   :  { %s307_s12 = smov 128   ;;  %s308_s13 = smov 8  }
   0xd   :  { %21 = dma.hbm_to_vmem [thread:$0]  %s345_s0, 256, %s16_s10, [#allocation3], %s307_s12, %s307_s12, %s308_s13  }
   0xe   :  { %s309_s16 = smov [#allocation5]  }
   0xf   :  { %s27_s17 = sshll.u32 %s309_s16, 4  ;;  %s28_s17 = int_to_ptr.vmem [resolvable:$true] %s27_s17 }
  0x10   :  { %s268_s18 = scalar_lea.vmem %s28_s17, 1024  ;;  %p273_p6 = scmp.lt.s32.totalorder %s28_s17, %s28_s17 }
  0x11   :  { %p269_p5 = scmp.ne.s32.totalorder %s28_s17, %s268_s18  ;;  %p274_p7 = scmp.lt.s32.totalorder %s268_s18, %s268_s18 }
  0x13   :  { %p275_p8 = por %p274_p7, %p273_p6 }
  0x15   :  { %p276_p9 = pnand %p275_p8, %p269_p5 }
  0x17   :  { %279 = shalt.err (!%p276_p9)
}
  0x18   :  { %s310_s19 = smov 64   ;;  %s311_s20 = smov 4  }
  0x19   :  { %33 = dma.hbm_to_vmem [thread:$0]  %s346_s1, 1024, %s28_s17, [#allocation6], %s310_s19, %s310_s19, %s311_s20  }
  0x1a   :  { %300 = dma.done.wait [#allocation3], 256  }
  0x1b   :  { %301 = vsyncadd [#allocation3], 4294967040 }
  0x1c   :  { %302 = dma.done.wait [#allocation6], 1024  }
  0x1d   :  { %303 = vsyncadd [#allocation6], 4294966272  ;;  %v312_v0 = vmov 0.0   ;;  %vm313_vm0 = vmmov 0   ;;  %v232_v1 = vld [vmem:[#allocation5 + $0x38] sm:$0xff]   ;;  %v233_v2 = vld [vmem:[#allocation5 + $0x30] sm:$0xff]  }
  0x1e   :  { %203 = vmatprep.subr.bf16.mxu0 %v312_v0  ;;  %219 = vmatprep.mubr.msk.bf16.mxu0 %vm313_vm0, %v312_v0  ;;  %v234_v3 = vld [vmem:[#allocation5 + $0x28] sm:$0xff]   ;;  %v235_v4 = vld [vmem:[#allocation5 + $0x20] sm:$0xff]   ;;  %v236_v5 = vld [vmem:[#allocation5 + $0x18] sm:$0xff]   ;;  %s314_s0 = smov [#allocation7]  }
  0x1f   :  { %204 = vmatpush3.bf16.msra.mxu0 %v232_v1  ;;  %v237_v6 = vld [vmem:[#allocation5 + $0x10] sm:$0xff]   ;;  %v238_v7 = vld [vmem:[#allocation5 + $0x8] sm:$0xff]   ;;  %v239_v8 = vld [vmem:[#allocation5] sm:$0xff]   ;;  %s164_s1 = sshll.u32 %s314_s0, 4  ;;  %s165_s1 = int_to_ptr.vmem [resolvable:$true] %s164_s1 }
  0x20   :  { %205 = vmatprep.subr.bf16.mxu0 %v312_v0  ;;  %v41_v9 = vld [vmem:[#allocation2] sm:$0xff]  ;;  %v42_v10 = vld [vmem:[#allocation2 + $0x8] sm:$0xff]  ;;  %s280_s23 = scalar_lea.vmem %s165_s1, 128  ;;  %p285_p11 = scmp.lt.s32.totalorder %s165_s1, %s165_s1 }
  0x21   :  { %v43_v11 = vpack.c.bf16 %v42_v10, %v41_v9  ;;  %p281_p10 = scmp.ne.s32.totalorder %s165_s1, %s280_s23  ;;  %p286_p12 = scmp.lt.s32.totalorder %s280_s23, %s280_s23 }
  0x23   :  { %206 = vmatpush3.bf16.msra.mxu0 %v233_v2  ;;  %p287_p13 = por %p286_p12, %p285_p11 }
  0x24   :  { %207 = vmatprep.subr.bf16.mxu0 %v312_v0 }
  0x25   :  { %p288_p0 = pnand %p287_p13, %p281_p10 }
  0x27   :  { %208 = vmatpush3.bf16.msra.mxu0 %v234_v3 }
  0x28   :  { %209 = vmatprep.subr.bf16.mxu0 %v312_v0 }
  0x2b   :  { %210 = vmatpush3.bf16.msra.mxu0 %v235_v4 }
  0x2c   :  { %211 = vmatprep.subr.bf16.mxu0 %v312_v0 }
  0x2f   :  { %212 = vmatpush3.bf16.msra.mxu0 %v236_v5 }
  0x30   :  { %213 = vmatprep.subr.bf16.mxu0 %v312_v0 }
  0x33   :  { %214 = vmatpush3.bf16.msra.mxu0 %v237_v6 }
  0x34   :  { %215 = vmatprep.subr.bf16.mxu0 %v312_v0 }
  0x37   :  { %216 = vmatpush3.bf16.msra.mxu0 %v238_v7 }
  0x38   :  { %217 = vmatprep.subr.bf16.mxu0 %v312_v0 }
  0x3b   :  { %218 = vmatpush3.bf16.msra.mxu0 %v239_v8 }
  0x3e   :  { %220 = vmatmul.mubr.bf16.vlgmr.msra.gmra.mxu0 %v43_v11 }
  0xfe   :  { %v142_v12 = vpop.f32.mrf.mxu0 }
 0x100   :  { %v221_v13 = vpop.f32.mrf.mxu0 }
 0x102   :  { %v145_v14 = vpop.f32.mrf.mxu0 }
 0x103   :  { %v192_v15 = vpack.c.bf16 %v145_v14, %v142_v12 }
 0x104   :  { %v222_v16 = vpop.f32.mrf.mxu0 }
 0x105   :  { %193 = vst [vmem:[#allocation7] sm:$0xff] %v192_v15  }
 0x106   :  { %291 = shalt.err (!%p288_p0)
}
 0x107   :  { %170 = dma.vmem_to_hbm [thread:$0]  %s165_s1, 128, %s347_s2, [#allocation4], %s310_s19, %s310_s19, %s311_s20  }
 0x108   :  { %304 = dma.done.wait [#allocation4], 128  }
 0x109   :  { %305 = vsyncadd [#allocation4], 4294967168 }
 0x10a   :  { %174 = vsyncpa [#allocation3], 1 }
 0x10b   :  { %175 = vsyncpa [#allocation6], 1 }
 0x10c   :  { %176 = vsyncpa [#allocation4], 1 }

</bundles_post_ra>
